<compile_context>
chip_gen: v7x
topology: tpu7x:2x2x1
jax: 0.10.0
libtpu: 0.0.40
codegen_flags: <defaults>
</compile_context>

<pallas_src>
import jax
import jax.numpy as jnp
from jax.experimental import pallas as pl
from jax.experimental.pallas import tpu as pltpu


def _round_up(x, m):
    return (x + m - 1) // m * m


def gcnrec_kernel(u_ref, v_ref, wu_ref, wv_ref, b_ref, o_ref):
    # u_ref, v_ref : [TM, D] f32 (VMEM tiles)
    # wu_ref, wv_ref: [1, D] f32 (VMEM, grid-resident)
    # b_ref        : [1, 1] f32 (SMEM scalar)
    # o_ref        : [TM, 1] f32 (VMEM tile)
    prod = u_ref[...] * wu_ref[...] + v_ref[...] * wv_ref[...]        # [TM, D]  (VPU)
    o_ref[...] = jnp.sum(prod, axis=-1, keepdims=True) + b_ref[0, 0]  # [TM, 1]  (XLU reduce + sreg bias)


def gcnrec_forward(emb_table_u, emb_table_v, nodes_u, nodes_v, w_pt, b_pt,
                   *, tm=1024):
    """GCNRec forward.

    emb_table_u: [num_users, D] f32     emb_table_v: [num_items, D] f32
    nodes_u, nodes_v: [N] int32 indices
    w_pt: [1, 2D] f32   (PyTorch nn.Linear weight, concat order = (u, v))
    b_pt: [1]     f32   (PyTorch nn.Linear bias)
    returns: [N, 1] f32
    """
    d = emb_table_u.shape[1]
    n = nodes_u.shape[0]

    # Encoders == embedding lookups (plain-JAX gather glue).
    # TODO(synk): fuse the gather into the kernel (scalar-prefetched indices +
    # in-kernel row gather on VMEM-resident tables) to cut the [N,D]x2 HBM
    # round-trip in half.
    output_u = jnp.take(emb_table_u, nodes_u, axis=0).astype(jnp.float32)  # [N, D]
    output_v = jnp.take(emb_table_v, nodes_v, axis=0).astype(jnp.float32)  # [N, D]

    # Split the [1, 2D] weight into its u / v halves; bias as a (1,1) SMEM scalar.
    w_u = w_pt[:, :d].astype(jnp.float32)           # [1, D]
    w_v = w_pt[:, d:].astype(jnp.float32)           # [1, D]
    b = b_pt.reshape(1, 1).astype(jnp.float32)      # [1, 1]

    # Row-tile the batch; pad N up so the grid divides evenly (tile is a
    # multiple of 8 sublanes, D rides the lane axis untouched).
    tile = min(tm, _round_up(n, 8))
    n_pad = _round_up(n, tile)
    if n_pad != n:
        pad = ((0, n_pad - n), (0, 0))
        output_u = jnp.pad(output_u, pad)
        output_v = jnp.pad(output_v, pad)

    out = pl.pallas_call(
        gcnrec_kernel,
        out_shape=jax.ShapeDtypeStruct((n_pad, 1), jnp.float32),
        grid=(n_pad // tile,),
        in_specs=[
            pl.BlockSpec((tile, d), lambda i: (i, 0)),           # u tile
            pl.BlockSpec((tile, d), lambda i: (i, 0)),           # v tile
            pl.BlockSpec((1, d), lambda i: (0, 0)),              # w_u (resident)
            pl.BlockSpec((1, d), lambda i: (0, 0)),              # w_v (resident)
            pl.BlockSpec(memory_space=pltpu.MemorySpace.SMEM),   # bias scalar
        ],
        out_specs=pl.BlockSpec((tile, 1), lambda i: (i, 0)),
        compiler_params=pltpu.CompilerParams(
            dimension_semantics=("parallel",)),
    )(output_u, output_v, w_u, w_v, b)

    return out[:n]


if __name__ == "__main__":
    # Small, deterministic shapes consistent with the module.
    embed_dim = 32          # enc_u.embed_dim
    num_users = 16
    num_items = 16
    batch = 8               # number of (u, v) pairs

    key = jax.random.PRNGKey(0)
    k_eu, k_ev, k_w, k_b, k_nu, k_nv = jax.random.split(key, 6)

    # Deterministic synthetic parameters (encoders modeled as embedding tables).
    emb_table_u = jax.random.normal(k_eu, (num_users, embed_dim), dtype=jnp.float32)
    emb_table_v = jax.random.normal(k_ev, (num_items, embed_dim), dtype=jnp.float32)

    # nn.Linear(embed_dim * 2, 1): weight [1, 2D], bias [1].
    bound = float(1.0 / (embed_dim * 2) ** 0.5)
    w_pt = jax.random.uniform(k_w, (1, embed_dim * 2), dtype=jnp.float32,
                              minval=-bound, maxval=bound)
    b_pt = jax.random.uniform(k_b, (1,), dtype=jnp.float32,
                              minval=-bound, maxval=bound)

    nodes_u = jax.random.randint(k_nu, (batch,), 0, num_users, dtype=jnp.int32)
    nodes_v = jax.random.randint(k_nv, (batch,), 0, num_items, dtype=jnp.int32)

    fwd = jax.jit(gcnrec_forward)
    out = jax.block_until_ready(
        fwd(emb_table_u, emb_table_v, nodes_u, nodes_v, w_pt, b_pt))

    # Pure-JAX reference of the same semantics (concat + linear).
    ref_uv = jnp.concatenate(
        [jnp.take(emb_table_u, nodes_u, axis=0),
         jnp.take(emb_table_v, nodes_v, axis=0)], axis=1)
    ref = ref_uv @ w_pt.T + b_pt

    assert out.shape == (batch, 1)
    assert jnp.allclose(out, ref, atol=1e-5, rtol=1e-5)

    print("KERNEL_OK")
</pallas_src>

<mosaic_0001>
module attributes {stable_mosaic.version = 11 : i64} {
  func.func @gcnrec_kernel(%arg0: i32, %arg1: memref<8x32xf32, #tpu.memory_space<vmem>>, %arg2: memref<8x32xf32, #tpu.memory_space<vmem>>, %arg3: memref<1x32xf32, #tpu.memory_space<vmem>>, %arg4: memref<1x32xf32, #tpu.memory_space<vmem>>, %arg5: memref<1x1xf32, #tpu.memory_space<smem>>, %arg6: memref<8x1xf32, #tpu.memory_space<vmem>>) attributes {dimension_semantics = [#tpu.dimension_semantics<parallel>], iteration_bounds = array<i64: 1>, scalar_prefetch = 0 : i64, scratch_operands = 0 : i64, tpu.core_type = #tpu.core_type<tc>, window_params = [{transform_indices = @transform_0, window_bounds = array<i64: 8, 32>}, {transform_indices = @transform_1, window_bounds = array<i64: 8, 32>}, {pipeline_mode = #tpu.pipeline_mode<synchronous>, transform_indices = @transform_2, window_bounds = array<i64: 1, 32>}, {pipeline_mode = #tpu.pipeline_mode<synchronous>, transform_indices = @transform_3, window_bounds = array<i64: 1, 32>}, {transform_indices = @transform_4, window_bounds = array<i64: 1, 1>}, {transform_indices = @transform_5, window_bounds = array<i64: 8, 1>}]} {
    %c0 = arith.constant 0 : index
    %c0_0 = arith.constant 0 : index
    %0 = vector.load %arg1[%c0, %c0_0] : memref<8x32xf32, #tpu.memory_space<vmem>>, vector<8x32xf32>
    %c0_1 = arith.constant 0 : index
    %c0_2 = arith.constant 0 : index
    %1 = vector.load %arg3[%c0_1, %c0_2] : memref<1x32xf32, #tpu.memory_space<vmem>>, vector<1x32xf32>
    %2 = vector.broadcast %1 : vector<1x32xf32> to vector<8x32xf32>
    %3 = arith.mulf %0, %2 : vector<8x32xf32>
    %c0_3 = arith.constant 0 : index
    %c0_4 = arith.constant 0 : index
    %4 = vector.load %arg2[%c0_3, %c0_4] : memref<8x32xf32, #tpu.memory_space<vmem>>, vector<8x32xf32>
    %c0_5 = arith.constant 0 : index
    %c0_6 = arith.constant 0 : index
    %5 = vector.load %arg4[%c0_5, %c0_6] : memref<1x32xf32, #tpu.memory_space<vmem>>, vector<1x32xf32>
    %6 = vector.broadcast %5 : vector<1x32xf32> to vector<8x32xf32>
    %7 = arith.mulf %4, %6 : vector<8x32xf32>
    %8 = arith.addf %3, %7 : vector<8x32xf32>
    %cst = arith.constant dense<0.000000e+00> : vector<8xf32>
    %9 = vector.multi_reduction <add>, %8, %cst [1] : vector<8x32xf32> to vector<8xf32>
    %10 = vector.shape_cast %9 : vector<8xf32> to vector<8x1xf32>
    %c0_7 = arith.constant 0 : index
    %c0_8 = arith.constant 0 : index
    %11 = memref.load %arg5[%c0_7, %c0_8] : memref<1x1xf32, #tpu.memory_space<smem>>
    %12 = vector.broadcast %11 : f32 to vector<8x1xf32>
    %13 = arith.addf %10, %12 : vector<8x1xf32>
    %c0_9 = arith.constant 0 : index
    %c0_10 = arith.constant 0 : index
    %14 = vector.load %arg6[%c0_9, %c0_10] : memref<8x1xf32, #tpu.memory_space<vmem>>, vector<8x1xf32>
    tpu.vector_store %arg6[%c0_9, %c0_10], %13 {strides = array<i32>} : memref<8x1xf32, #tpu.memory_space<vmem>>, vector<8x1xf32>,
    return
  }
  func.func @transform_0(%arg0: i32) -> (i32, i32) {
    %c0_i32 = arith.constant 0 : i32
    %c0_i32_0 = arith.constant 0 : i32
    return %arg0, %c0_i32 : i32, i32
  }
  func.func @transform_1(%arg0: i32) -> (i32, i32) {
    %c0_i32 = arith.constant 0 : i32
    %c0_i32_0 = arith.constant 0 : i32
    return %arg0, %c0_i32 : i32, i32
  }
  func.func @transform_2(%arg0: i32) -> (i32, i32) {
    %c0_i32 = arith.constant 0 : i32
    %c0_i32_0 = arith.constant 0 : i32
    %c0_i32_1 = arith.constant 0 : i32
    return %c0_i32, %c0_i32_0 : i32, i32
  }
  func.func @transform_3(%arg0: i32) -> (i32, i32) {
    %c0_i32 = arith.constant 0 : i32
    %c0_i32_0 = arith.constant 0 : i32
    %c0_i32_1 = arith.constant 0 : i32
    return %c0_i32, %c0_i32_0 : i32, i32
  }
  func.func @transform_4(%arg0: i32) -> (i32, i32) {
    %c0_i32 = arith.constant 0 : i32
    %c0_i32_0 = arith.constant 0 : i32
    %c0_i32_1 = arith.constant 0 : i32
    return %c0_i32, %c0_i32_0 : i32, i32
  }
  func.func @transform_5(%arg0: i32) -> (i32, i32) {
    %c0_i32 = arith.constant 0 : i32
    %c0_i32_0 = arith.constant 0 : i32
    return %arg0, %c0_i32 : i32, i32
  }
}

</mosaic_0001>

<bundles_post_ra>
// kernel: gcnrec_forward.1
= control target key start
LH: loop header
LB: loop body
LE: loop exit
PB: predicated region body
PF: predicated region fallthrough
CT: control target
= control target key end

     0   :  { %vm40_vm0 = vcmask 261120   ;;  %vm47_vm1 = vcmask 7168   ;;  %s103_s0 = inlined_call_operand.vmem [shape: f32[8,32], index: 0, kind: input, shape index: {}]   ;;  %s104_s1 = inlined_call_operand.vmem [shape: f32[8,32], index: 1, kind: input, shape index: {}]   ;;  %s105_s2 = inlined_call_operand.vmem [shape: f32[1,32], index: 2, kind: input, shape index: {}]   ;;  %s106_s3 = inlined_call_operand.vmem [shape: f32[1,32], index: 3, kind: input, shape index: {}]   ;;  %s107_s4 = inlined_call_operand.<no memory space> [shape: f32[1,1], index: 4, kind: input, shape index: {}]   ;;  %s108_s5 = inlined_call_operand.vmem [shape: f32[8,1], index: 5, kind: output, shape index: {}]  }
   0x1   :  { %v21_v0 = vld [vmem:[%s103_s0] sm:$0xff]  ;;  %v45_v8 = vstv %s107_s4 }
   0x2   :  { %v53_v1 = vld [vmem:[%s105_s2] ss:$0 sm:$0xff] }
   0x3   :  { %v30_v2 = vld [vmem:[%s104_s1] sm:$0xff]  ;;  %v29_v3 = vmul.f32 %v53_v1, %v21_v0 }
   0x4   :  { %v54_v4 = vld [vmem:[%s106_s3] ss:$0 sm:$0xff] }
   0x5   :  { %v38_v5 = vmul.f32 %v54_v4, %v30_v2 }
   0x7   :  { %v39_v6 = vadd.f32 %v38_v5, %v29_v3 }
   0x9   :  { %v41_v7 = vsel %vm40_vm0, %v39_v6, 0.0 }
   0xa   :  { %42 = vadd.xlane.f32.xlu0 %v41_v7 }
  0x97   :  { %v43_v9 = vpop.xlane.xlu0 %42 }
  0x98   :  { %v46_v10 = vadd.f32 %v45_v8, %v43_v9 }
  0x9a   :  { %48 = vst.msk [vmem:[%s108_s5] sm:$0xff] %vm47_vm1, %v46_v10 }

</bundles_post_ra>
